<compile_context>
chip_gen: v7x
topology: tpu7x:2x2x1
jax: 0.10.0
libtpu: 0.0.40
codegen_flags: <defaults>
</compile_context>

<pallas_src>
import jax
import jax.numpy as jnp
from jax import lax
from jax.experimental import pallas as pl
from jax.experimental.pallas import tpu as pltpu


def _residual_block_kernel(xp_ref, xh_ref, w1_ref, b1_ref, wm_ref, bm_ref,
                           w2_ref, b2_ref, w3_ref, b3_ref, out_ref, patch_ref):
    # xp_ref   : (1, 4, T, Wo, Cin)  bf16  parity planes x[:, p::2, q::2, :],
    #                                      plane k = 2*p + q, row-tiled over Ho
    # xh_ref   : (1, 1, 2, Wo, Cin)  bf16  halo row: p=1 planes at output row
    #                                      t*T - 1 (content ignored when t==0)
    # w1_ref   : (Cin, Cmid)         bf16  conv1 1x1
    # b1_ref   : (1, Cmid)           f32
    # wm_ref   : (Cin, Cout)         bf16  minor-branch 1x1 (stride 2)
    # bm_ref   : (1, Cout)           f32
    # w2_ref   : (9*Cmid, Cmid)      bf16  conv2 3x3, im2col rows = (kh, kw, ci)
    # b2_ref   : (1, Cmid)           f32
    # w3_ref   : (Cmid, Cout)        bf16  conv3 1x1
    # b3_ref   : (1, Cout)           f32
    # out_ref  : (1, T, Wo, Cout)    f32
    # patch_ref: (T, Wo, 9*Cmid)     bf16  im2col scratch (fully rewritten/step)
    _, _, T, Wo, Cin = xp_ref.shape
    Cmid = w1_ref.shape[1]
    Cout = w3_ref.shape[1]
    t = pl.program_id(1)

    # ---- conv1 (1x1) + relu on the 4 parity planes of this row tile ---------
    x_all = xp_ref[0].reshape(4 * T * Wo, Cin)
    y1 = jnp.maximum(
        jnp.dot(x_all, w1_ref[...], preferred_element_type=jnp.float32)
        + b1_ref[...], 0.0).astype(jnp.bfloat16)             # (4*T*Wo, Cmid)
    planes = [y1[k * T * Wo:(k + 1) * T * Wo].reshape(T, Wo, Cmid)
              for k in range(4)]                              # k = 2*p + q

    # ---- conv1 + relu on the halo row (y1 row t*T - 1 of the p=1 planes) ----
    xh = xh_ref[0, 0].reshape(2 * Wo, Cin)
    yh = jnp.maximum(
        jnp.dot(xh, w1_ref[...], preferred_element_type=jnp.float32)
        + b1_ref[...], 0.0)
    # global y1 row -1 is conv2's zero padding (NOT relu(b1)): zero it on t==0
    yh = jnp.where(t == 0, 0.0, yh).astype(jnp.bfloat16).reshape(2, Wo, Cmid)

    # ---- minor branch: 1x1 stride-2 conv + relu, only the (p=0,q=0) plane ---
    x00 = xp_ref[0, 0].reshape(T * Wo, Cin)
    ym = jnp.maximum(
        jnp.dot(x00, wm_ref[...], preferred_element_type=jnp.float32)
        + bm_ref[...], 0.0)                                   # (T*Wo, Cout) f32

    # ---- scatter the 9 stride-2 taps of the 3x3 conv into the im2col buffer.
    # out2[r, c] = sum_{kh,kw} y1[2*(t*T+r)+kh-1, 2*c+kw-1] @ w2[kh, kw].
    # row side: kh==1 -> p=0 plane row r; kh==2 -> p=1 row r; kh==0 -> p=1 row
    # r-1 (row 0 of the tile comes from the halo input).  col side: kw==1 ->
    # q=0 col c; kw==2 -> q=1 col c; kw==0 -> q=1 col c-1 with col 0 = zero
    # padding, built as a whole slab so every patch store is aligned.
    if T > 1:
        top = [jnp.concatenate([yh[q:q + 1], planes[2 + q][:T - 1]], axis=0)
               for q in range(2)]                             # (T, Wo, Cmid)
    else:
        top = [yh[q:q + 1] for q in range(2)]
    tap_rows = {0: top, 1: planes[0:2], 2: planes[2:4]}       # [kh][q]
    zcol = jnp.zeros((T, 1, Cmid), jnp.bfloat16)
    for kh in range(3):
        for kw in range(3):
            q = (kw + 1) % 2
            src = tap_rows[kh][q]                             # (T, Wo, Cmid)
            if kw == 0:
                src = jnp.concatenate([zcol, src[:, :Wo - 1, :]], axis=1)
            c0 = (kh * 3 + kw) * Cmid
            patch_ref[:, :, c0:c0 + Cmid] = src

    # ---- conv2: 3x3 stride-2 as ONE im2col matmul (K = 9*Cmid) --------------
    y2 = jnp.maximum(
        jnp.dot(patch_ref[...].reshape(T * Wo, 9 * Cmid), w2_ref[...],
                preferred_element_type=jnp.float32)
        + b2_ref[...], 0.0)                                   # (T*Wo, Cmid)

    # ---- conv3 (1x1) + residual add + relu ----------------------------------
    y3 = jnp.dot(y2.astype(jnp.bfloat16), w3_ref[...],
                 preferred_element_type=jnp.float32) + b3_ref[...]
    out_ref[...] = jnp.maximum(y3 + ym, 0.0).reshape(1, T, Wo, Cout)


def residual_block(x_nchw, params, *, row_tile=None):
    """Pallas Residual_block. x_nchw: (N, Cin, H, W) float32, H and W even."""
    N, Cin, H, W = x_nchw.shape
    assert H % 2 == 0 and W % 2 == 0, "parity decomposition requires even H, W"
    Ho, Wo = H // 2, W // 2
    w1, b1, w2, b2, w3, b3, wm, bm = params
    Cmid = w1.shape[0]
    Cout = w3.shape[0]

    if row_tile is None:
        row_tile = Ho
        for cand in (64, 32, 16, 8, 4, 2, 1):
            if cand <= Ho and Ho % cand == 0:
                row_tile = cand
                break
    T = row_tile
    assert 1 <= T <= Ho and Ho % T == 0, "row_tile must divide H // 2"
    nt = Ho // T

    # NCHW -> spatial parity planes x[:, :, p::2, q::2] in channel-last order:
    # one transpose + reshape + bf16 cast.
    xpq = x_nchw.reshape(N, Cin, Ho, 2, Wo, 2)
    xpq = jnp.transpose(xpq, (0, 3, 5, 2, 4, 1))       # (N, 2(p), 2(q), Ho, Wo, Cin)
    xp = xpq.reshape(N, 4, Ho, Wo, Cin).astype(jnp.bfloat16)

    # per-tile halo rows: p=1 parity planes at output row t*T - 1 (clipped to 0
    # for t==0; the kernel zeroes that row in y1 space).
    idx = jnp.clip(jnp.arange(nt) * T - 1, 0, Ho - 1)
    xh = jnp.take(xpq[:, 1], idx, axis=2)              # (N, 2(q), nt, Wo, Cin)
    xh = jnp.transpose(xh, (0, 2, 1, 3, 4)).astype(jnp.bfloat16)

    # torch OIHW weights -> matmul operands (bf16 weights, f32 bias / accum)
    w1m = jnp.transpose(w1[:, :, 0, 0], (1, 0)).astype(jnp.bfloat16)
    b1m = b1.reshape(1, Cmid).astype(jnp.float32)
    wmm = jnp.transpose(wm[:, :, 0, 0], (1, 0)).astype(jnp.bfloat16)
    bmm = bm.reshape(1, Cout).astype(jnp.float32)
    w2f = jnp.transpose(w2, (2, 3, 1, 0)).reshape(9 * Cmid, Cmid)
    w2f = w2f.astype(jnp.bfloat16)                      # rows ordered (kh, kw, ci)
    b2m = b2.reshape(1, Cmid).astype(jnp.float32)
    w3m = jnp.transpose(w3[:, :, 0, 0], (1, 0)).astype(jnp.bfloat16)
    b3m = b3.reshape(1, Cout).astype(jnp.float32)

    # explicit VMEM budget: double-buffered in/out blocks + scratch + temporaries
    blk_in = 4 * T * Wo * Cin * 2 + 2 * Wo * Cin * 2
    blk_out = T * Wo * Cout * 4
    patch = T * Wo * 9 * Cmid * 2
    wts = 2 * (Cin * Cmid + Cin * Cout + 9 * Cmid * Cmid + Cmid * Cout) \
        + 4 * 2 * (Cmid + Cout)
    temps = T * Wo * (4 * Cmid + Cmid + 2 * Cout) * 4
    need = 2 * (blk_in + blk_out) + patch + 2 * wts + temps
    vmem_limit = int(min(100 * 1024 * 1024,
                         max(32 * 1024 * 1024, 1.5 * need)))

    out_nhwc = pl.pallas_call(
        _residual_block_kernel,
        out_shape=jax.ShapeDtypeStruct((N, Ho, Wo, Cout), jnp.float32),
        grid_spec=pltpu.PrefetchScalarGridSpec(
            num_scalar_prefetch=0,
            grid=(N, nt),
            in_specs=[
                pl.BlockSpec((1, 4, T, Wo, Cin), lambda n, t: (n, 0, t, 0, 0)),
                pl.BlockSpec((1, 1, 2, Wo, Cin), lambda n, t: (n, t, 0, 0, 0)),
                pl.BlockSpec((Cin, Cmid), lambda n, t: (0, 0)),
                pl.BlockSpec((1, Cmid), lambda n, t: (0, 0)),
                pl.BlockSpec((Cin, Cout), lambda n, t: (0, 0)),
                pl.BlockSpec((1, Cout), lambda n, t: (0, 0)),
                pl.BlockSpec((9 * Cmid, Cmid), lambda n, t: (0, 0)),
                pl.BlockSpec((1, Cmid), lambda n, t: (0, 0)),
                pl.BlockSpec((Cmid, Cout), lambda n, t: (0, 0)),
                pl.BlockSpec((1, Cout), lambda n, t: (0, 0)),
            ],
            out_specs=pl.BlockSpec((1, T, Wo, Cout), lambda n, t: (n, t, 0, 0)),
            scratch_shapes=[pltpu.VMEM((T, Wo, 9 * Cmid), jnp.bfloat16)],
        ),
        compiler_params=pltpu.CompilerParams(
            dimension_semantics=("parallel", "parallel"),
            vmem_limit_bytes=vmem_limit),
    )(xp, xh, w1m, b1m, wmm, bmm, w2f, b2m, w3m, b3m)

    # TODO(synk): keep NHWC/parity bf16 layout between chained residual blocks
    # to drop this transpose HBM pass and halve output writeback.
    return jnp.transpose(out_nhwc, (0, 3, 1, 2))        # back to NCHW


# ----------------------------- reference & setup -----------------------------

def _conv2d_nchw(x, w, b, stride, pad):
    y = lax.conv_general_dilated(
        x, w, window_strides=(stride, stride),
        padding=((pad, pad), (pad, pad)),
        dimension_numbers=("NCHW", "OIHW", "NCHW"))
    return y + b[None, :, None, None]


def residual_block_ref(x, params):
    w1, b1, w2, b2, w3, b3, wm, bm = params
    h = jax.nn.relu(_conv2d_nchw(x, w1, b1, 1, 0))
    h = jax.nn.relu(_conv2d_nchw(h, w2, b2, 2, 1))
    x1 = _conv2d_nchw(h, w3, b3, 1, 0)
    x2 = jax.nn.relu(_conv2d_nchw(x, wm, bm, 2, 0))
    return jax.nn.relu(x1 + x2)


def init_params(key, c_in, c_out):
    """Deterministic synthetic params with torch Conv2d shapes (OIHW)."""
    c_mid = c_in // 2
    ks = jax.random.split(key, 8)

    def u(k, shape, fan_in):
        bound = 1.0 / (fan_in ** 0.5)
        return jax.random.uniform(k, shape, jnp.float32, -bound, bound)

    w1 = u(ks[0], (c_mid, c_in, 1, 1), c_in)
    b1 = u(ks[1], (c_mid,), c_in)
    w2 = u(ks[2], (c_mid, c_mid, 3, 3), c_mid * 9)
    b2 = u(ks[3], (c_mid,), c_mid * 9)
    w3 = u(ks[4], (c_out, c_mid, 1, 1), c_mid)
    b3 = u(ks[5], (c_out,), c_mid)
    wm = u(ks[6], (c_out, c_in, 1, 1), c_in)
    bm = u(ks[7], (c_out,), c_in)
    return (w1, b1, w2, b2, w3, b3, wm, bm)


if __name__ == "__main__":
    key = jax.random.PRNGKey(0)
    kx, kp = jax.random.split(key)

    N, Cin, H, W = 2, 8, 16, 16
    Cout = 16

    x = jax.random.normal(kx, (N, Cin, H, W), jnp.float32)
    params = init_params(kp, Cin, Cout)

    # row_tile=4 -> grid (N, 2): exercises the multi-tile halo path.
    out = jax.block_until_ready(residual_block(x, params, row_tile=4))
    ref = residual_block_ref(x, params)

    assert out.shape == (N, Cout, H // 2, W // 2), out.shape
    # bf16 matmul operands / activations with f32 accumulation -> loose tol.
    err = float(jnp.max(jnp.abs(out - ref)))
    assert jnp.allclose(out, ref, atol=5e-2, rtol=5e-2), err
    print("KERNEL_OK")
</pallas_src>

<mosaic_0001>
module attributes {stable_mosaic.version = 11 : i64} {
  func.func @_residual_block_kernel(%arg0: i32, %arg1: i32, %arg2: memref<1x4x4x8x8xbf16, #tpu.memory_space<vmem>>, %arg3: memref<1x1x2x8x8xbf16, #tpu.memory_space<vmem>>, %arg4: memref<8x4xbf16, #tpu.memory_space<vmem>>, %arg5: memref<1x4xf32, #tpu.memory_space<vmem>>, %arg6: memref<8x16xbf16, #tpu.memory_space<vmem>>, %arg7: memref<1x16xf32, #tpu.memory_space<vmem>>, %arg8: memref<36x4xbf16, #tpu.memory_space<vmem>>, %arg9: memref<1x4xf32, #tpu.memory_space<vmem>>, %arg10: memref<4x16xbf16, #tpu.memory_space<vmem>>, %arg11: memref<1x16xf32, #tpu.memory_space<vmem>>, %arg12: memref<1x4x8x16xf32, #tpu.memory_space<vmem>>, %arg13: memref<4x8x36xbf16, #tpu.memory_space<vmem>>) attributes {dimension_semantics = [#tpu.dimension_semantics<parallel>, #tpu.dimension_semantics<parallel>], iteration_bounds = array<i64: 2, 2>, scalar_prefetch = 0 : i64, scratch_operands = 1 : i64, tpu.core_type = #tpu.core_type<tc>, window_params = [{transform_indices = @transform_0, window_bounds = array<i64: 1, 4, 4, 8, 8>}, {transform_indices = @transform_1, window_bounds = array<i64: 1, 1, 2, 8, 8>}, {pipeline_mode = #tpu.pipeline_mode<synchronous>, transform_indices = @transform_2, window_bounds = array<i64: 8, 4>}, {pipeline_mode = #tpu.pipeline_mode<synchronous>, transform_indices = @transform_3, window_bounds = array<i64: 1, 4>}, {pipeline_mode = #tpu.pipeline_mode<synchronous>, transform_indices = @transform_4, window_bounds = array<i64: 8, 16>}, {pipeline_mode = #tpu.pipeline_mode<synchronous>, transform_indices = @transform_5, window_bounds = array<i64: 1, 16>}, {pipeline_mode = #tpu.pipeline_mode<synchronous>, transform_indices = @transform_6, window_bounds = array<i64: 36, 4>}, {pipeline_mode = #tpu.pipeline_mode<synchronous>, transform_indices = @transform_7, window_bounds = array<i64: 1, 4>}, {pipeline_mode = #tpu.pipeline_mode<synchronous>, transform_indices = @transform_8, window_bounds = array<i64: 4, 16>}, {pipeline_mode = #tpu.pipeline_mode<synchronous>, transform_indices = @transform_9, window_bounds = array<i64: 1, 16>}, {transform_indices = @transform_10, window_bounds = array<i64: 1, 4, 8, 16>}]} {
    %c0 = arith.constant 0 : index
    %c0_0 = arith.constant 0 : index
    %c0_1 = arith.constant 0 : index
    %c0_2 = arith.constant 0 : index
    %c0_3 = arith.constant 0 : index
    %0 = vector.load %arg2[%c0, %c0_0, %c0_1, %c0_2, %c0_3] : memref<1x4x4x8x8xbf16, #tpu.memory_space<vmem>>, vector<1x4x4x8x8xbf16>
    %1 = vector.shape_cast %0 : vector<1x4x4x8x8xbf16> to vector<4x4x8x8xbf16>
    %2 = vector.shape_cast %1 : vector<4x4x8x8xbf16> to vector<128x8xbf16>
    %c0_4 = arith.constant 0 : index
    %c0_5 = arith.constant 0 : index
    %3 = vector.load %arg4[%c0_4, %c0_5] : memref<8x4xbf16, #tpu.memory_space<vmem>>, vector<8x4xbf16>
    %cst = arith.constant dense<0.000000e+00> : vector<128x4xf32>
    %4 = tpu.matmul %2, %3, %cst {dimension_numbers = #tpu.dot_dimension_numbers<[1], [0], [0], [1], [0, 0, 1, 1], [], []>} : vector<128x8xbf16>, vector<8x4xbf16>, vector<128x4xf32> -> vector<128x4xf32>
    %c0_6 = arith.constant 0 : index
    %c0_7 = arith.constant 0 : index
    %5 = vector.load %arg5[%c0_6, %c0_7] : memref<1x4xf32, #tpu.memory_space<vmem>>, vector<1x4xf32>
    %6 = vector.broadcast %5 : vector<1x4xf32> to vector<128x4xf32>
    %7 = arith.addf %4, %6 : vector<128x4xf32>
    %cst_8 = arith.constant 0.000000e+00 : f32
    %8 = vector.broadcast %cst_8 : f32 to vector<128x4xf32>
    %9 = arith.maximumf %7, %8 : vector<128x4xf32>
    %10 = arith.truncf %9 : vector<128x4xf32> to vector<128x4xbf16>
    %11 = vector.extract_strided_slice %10 {offsets = [0, 0], sizes = [32, 4], strides = [1, 1]} : vector<128x4xbf16> to vector<32x4xbf16>
    %12 = vector.shape_cast %11 : vector<32x4xbf16> to vector<4x8x4xbf16>
    %13 = vector.extract_strided_slice %10 {offsets = [32, 0], sizes = [32, 4], strides = [1, 1]} : vector<128x4xbf16> to vector<32x4xbf16>
    %14 = vector.shape_cast %13 : vector<32x4xbf16> to vector<4x8x4xbf16>
    %15 = vector.extract_strided_slice %10 {offsets = [64, 0], sizes = [32, 4], strides = [1, 1]} : vector<128x4xbf16> to vector<32x4xbf16>
    %16 = vector.shape_cast %15 : vector<32x4xbf16> to vector<4x8x4xbf16>
    %17 = vector.extract_strided_slice %10 {offsets = [96, 0], sizes = [32, 4], strides = [1, 1]} : vector<128x4xbf16> to vector<32x4xbf16>
    %18 = vector.shape_cast %17 : vector<32x4xbf16> to vector<4x8x4xbf16>
    %c0_9 = arith.constant 0 : index
    %c0_10 = arith.constant 0 : index
    %c0_11 = arith.constant 0 : index
    %c0_12 = arith.constant 0 : index
    %c0_13 = arith.constant 0 : index
    %19 = vector.load %arg3[%c0_9, %c0_10, %c0_11, %c0_12, %c0_13] : memref<1x1x2x8x8xbf16, #tpu.memory_space<vmem>>, vector<1x1x2x8x8xbf16>
    %20 = vector.shape_cast %19 : vector<1x1x2x8x8xbf16> to vector<2x8x8xbf16>
    %21 = vector.shape_cast %20 : vector<2x8x8xbf16> to vector<16x8xbf16>
    %c0_14 = arith.constant 0 : index
    %c0_15 = arith.constant 0 : index
    %22 = vector.load %arg4[%c0_14, %c0_15] : memref<8x4xbf16, #tpu.memory_space<vmem>>, vector<8x4xbf16>
    %cst_16 = arith.constant dense<0.000000e+00> : vector<16x4xf32>
    %23 = tpu.matmul %21, %22, %cst_16 {dimension_numbers = #tpu.dot_dimension_numbers<[1], [0], [0], [1], [0, 0, 1, 1], [], []>} : vector<16x8xbf16>, vector<8x4xbf16>, vector<16x4xf32> -> vector<16x4xf32>
    %c0_17 = arith.constant 0 : index
    %c0_18 = arith.constant 0 : index
    %24 = vector.load %arg5[%c0_17, %c0_18] : memref<1x4xf32, #tpu.memory_space<vmem>>, vector<1x4xf32>
    %25 = vector.broadcast %24 : vector<1x4xf32> to vector<16x4xf32>
    %26 = arith.addf %23, %25 : vector<16x4xf32>
    %cst_19 = arith.constant 0.000000e+00 : f32
    %27 = vector.broadcast %cst_19 : f32 to vector<16x4xf32>
    %28 = arith.maximumf %26, %27 : vector<16x4xf32>
    %c0_i32 = arith.constant 0 : i32
    %29 = arith.cmpi eq, %arg1, %c0_i32 : i32
    %cst_20 = arith.constant 0.000000e+00 : f32
    %30 = vector.broadcast %cst_20 : f32 to vector<16x4xf32>
    %31 = arith.select %29, %30, %28 : vector<16x4xf32>
    %32 = arith.truncf %31 : vector<16x4xf32> to vector<16x4xbf16>
    %33 = vector.shape_cast %32 : vector<16x4xbf16> to vector<2x8x4xbf16>
    %c0_21 = arith.constant 0 : index
    %c0_22 = arith.constant 0 : index
    %c0_23 = arith.constant 0 : index
    %c0_24 = arith.constant 0 : index
    %c0_25 = arith.constant 0 : index
    %34 = vector.load %arg2[%c0_21, %c0_22, %c0_23, %c0_24, %c0_25] : memref<1x4x4x8x8xbf16, #tpu.memory_space<vmem>>, vector<1x1x4x8x8xbf16>
    %35 = vector.shape_cast %34 : vector<1x1x4x8x8xbf16> to vector<4x8x8xbf16>
    %36 = vector.shape_cast %35 : vector<4x8x8xbf16> to vector<32x8xbf16>
    %c0_26 = arith.constant 0 : index
    %c0_27 = arith.constant 0 : index
    %37 = vector.load %arg6[%c0_26, %c0_27] : memref<8x16xbf16, #tpu.memory_space<vmem>>, vector<8x16xbf16>
    %cst_28 = arith.constant dense<0.000000e+00> : vector<32x16xf32>
    %38 = tpu.matmul %36, %37, %cst_28 {dimension_numbers = #tpu.dot_dimension_numbers<[1], [0], [0], [1], [0, 0, 1, 1], [], []>} : vector<32x8xbf16>, vector<8x16xbf16>, vector<32x16xf32> -> vector<32x16xf32>
    %c0_29 = arith.constant 0 : index
    %c0_30 = arith.constant 0 : index
    %39 = vector.load %arg7[%c0_29, %c0_30] : memref<1x16xf32, #tpu.memory_space<vmem>>, vector<1x16xf32>
    %40 = vector.broadcast %39 : vector<1x16xf32> to vector<32x16xf32>
    %41 = arith.addf %38, %40 : vector<32x16xf32>
    %cst_31 = arith.constant 0.000000e+00 : f32
    %42 = vector.broadcast %cst_31 : f32 to vector<32x16xf32>
    %43 = arith.maximumf %41, %42 : vector<32x16xf32>
    %44 = vector.extract_strided_slice %33 {offsets = [0, 0, 0], sizes = [1, 8, 4], strides = [1, 1, 1]} : vector<2x8x4xbf16> to vector<1x8x4xbf16>
    %45 = vector.extract_strided_slice %16 {offsets = [0, 0, 0], sizes = [3, 8, 4], strides = [1, 1, 1]} : vector<4x8x4xbf16> to vector<3x8x4xbf16>
    %46 = tpu.concatenate %44, %45 in 0 : vector<1x8x4xbf16>, vector<3x8x4xbf16> -> vector<4x8x4xbf16>
    %47 = vector.extract_strided_slice %33 {offsets = [1, 0, 0], sizes = [1, 8, 4], strides = [1, 1, 1]} : vector<2x8x4xbf16> to vector<1x8x4xbf16>
    %48 = vector.extract_strided_slice %18 {offsets = [0, 0, 0], sizes = [3, 8, 4], strides = [1, 1, 1]} : vector<4x8x4xbf16> to vector<3x8x4xbf16>
    %49 = tpu.concatenate %47, %48 in 0 : vector<1x8x4xbf16>, vector<3x8x4xbf16> -> vector<4x8x4xbf16>
    %cst_32 = arith.constant 0.000000e+00 : bf16
    %50 = vector.broadcast %cst_32 : bf16 to vector<4x1x4xbf16>
    %51 = vector.extract_strided_slice %49 {offsets = [0, 0, 0], sizes = [4, 7, 4], strides = [1, 1, 1]} : vector<4x8x4xbf16> to vector<4x7x4xbf16>
    %52 = tpu.concatenate %50, %51 in 1 : vector<4x1x4xbf16>, vector<4x7x4xbf16> -> vector<4x8x4xbf16>
    %c0_33 = arith.constant 0 : index
    %c0_34 = arith.constant 0 : index
    %c0_35 = arith.constant 0 : index
    %53 = vector.load %arg13[%c0_33, %c0_34, %c0_35] : memref<4x8x36xbf16, #tpu.memory_space<vmem>>, vector<4x8x4xbf16>
    tpu.vector_store %arg13[%c0_33, %c0_34, %c0_35], %52 {strides = array<i32>} : memref<4x8x36xbf16, #tpu.memory_space<vmem>>, vector<4x8x4xbf16>,
    %c0_36 = arith.constant 0 : index
    %c0_37 = arith.constant 0 : index
    %c4 = arith.constant 4 : index
    %54 = vector.load %arg13[%c0_36, %c0_37, %c4] : memref<4x8x36xbf16, #tpu.memory_space<vmem>>, vector<4x8x4xbf16>
    tpu.vector_store %arg13[%c0_36, %c0_37, %c4], %46 {strides = array<i32>} : memref<4x8x36xbf16, #tpu.memory_space<vmem>>, vector<4x8x4xbf16>,
    %c0_38 = arith.constant 0 : index
    %c0_39 = arith.constant 0 : index
    %c8 = arith.constant 8 : index
    %55 = vector.load %arg13[%c0_38, %c0_39, %c8] : memref<4x8x36xbf16, #tpu.memory_space<vmem>>, vector<4x8x4xbf16>
    tpu.vector_store %arg13[%c0_38, %c0_39, %c8], %49 {strides = array<i32>} : memref<4x8x36xbf16, #tpu.memory_space<vmem>>, vector<4x8x4xbf16>,
    %56 = vector.extract_strided_slice %14 {offsets = [0, 0, 0], sizes = [4, 7, 4], strides = [1, 1, 1]} : vector<4x8x4xbf16> to vector<4x7x4xbf16>
    %57 = tpu.concatenate %50, %56 in 1 : vector<4x1x4xbf16>, vector<4x7x4xbf16> -> vector<4x8x4xbf16>
    %c0_40 = arith.constant 0 : index
    %c0_41 = arith.constant 0 : index
    %c12 = arith.constant 12 : index
    %58 = vector.load %arg13[%c0_40, %c0_41, %c12] : memref<4x8x36xbf16, #tpu.memory_space<vmem>>, vector<4x8x4xbf16>
    tpu.vector_store %arg13[%c0_40, %c0_41, %c12], %57 {strides = array<i32>} : memref<4x8x36xbf16, #tpu.memory_space<vmem>>, vector<4x8x4xbf16>,
    %c0_42 = arith.constant 0 : index
    %c0_43 = arith.constant 0 : index
    %c16 = arith.constant 16 : index
    %59 = vector.load %arg13[%c0_42, %c0_43, %c16] : memref<4x8x36xbf16, #tpu.memory_space<vmem>>, vector<4x8x4xbf16>
    tpu.vector_store %arg13[%c0_42, %c0_43, %c16], %12 {strides = array<i32>} : memref<4x8x36xbf16, #tpu.memory_space<vmem>>, vector<4x8x4xbf16>,
    %c0_44 = arith.constant 0 : index
    %c0_45 = arith.constant 0 : index
    %c20 = arith.constant 20 : index
    %60 = vector.load %arg13[%c0_44, %c0_45, %c20] : memref<4x8x36xbf16, #tpu.memory_space<vmem>>, vector<4x8x4xbf16>
    tpu.vector_store %arg13[%c0_44, %c0_45, %c20], %14 {strides = array<i32>} : memref<4x8x36xbf16, #tpu.memory_space<vmem>>, vector<4x8x4xbf16>,
    %61 = vector.extract_strided_slice %18 {offsets = [0, 0, 0], sizes = [4, 7, 4], strides = [1, 1, 1]} : vector<4x8x4xbf16> to vector<4x7x4xbf16>
    %62 = tpu.concatenate %50, %61 in 1 : vector<4x1x4xbf16>, vector<4x7x4xbf16> -> vector<4x8x4xbf16>
    %c0_46 = arith.constant 0 : index
    %c0_47 = arith.constant 0 : index
    %c24 = arith.constant 24 : index
    %63 = vector.load %arg13[%c0_46, %c0_47, %c24] : memref<4x8x36xbf16, #tpu.memory_space<vmem>>, vector<4x8x4xbf16>
    tpu.vector_store %arg13[%c0_46, %c0_47, %c24], %62 {strides = array<i32>} : memref<4x8x36xbf16, #tpu.memory_space<vmem>>, vector<4x8x4xbf16>,
    %c0_48 = arith.constant 0 : index
    %c0_49 = arith.constant 0 : index
    %c28 = arith.constant 28 : index
    %64 = vector.load %arg13[%c0_48, %c0_49, %c28] : memref<4x8x36xbf16, #tpu.memory_space<vmem>>, vector<4x8x4xbf16>
    tpu.vector_store %arg13[%c0_48, %c0_49, %c28], %16 {strides = array<i32>} : memref<4x8x36xbf16, #tpu.memory_space<vmem>>, vector<4x8x4xbf16>,
    %c0_50 = arith.constant 0 : index
    %c0_51 = arith.constant 0 : index
    %c32 = arith.constant 32 : index
    %65 = vector.load %arg13[%c0_50, %c0_51, %c32] : memref<4x8x36xbf16, #tpu.memory_space<vmem>>, vector<4x8x4xbf16>
    tpu.vector_store %arg13[%c0_50, %c0_51, %c32], %18 {strides = array<i32>} : memref<4x8x36xbf16, #tpu.memory_space<vmem>>, vector<4x8x4xbf16>,
    %c0_52 = arith.constant 0 : index
    %c0_53 = arith.constant 0 : index
    %c0_54 = arith.constant 0 : index
    %66 = vector.load %arg13[%c0_52, %c0_53, %c0_54] : memref<4x8x36xbf16, #tpu.memory_space<vmem>>, vector<4x8x36xbf16>
    %67 = vector.shape_cast %66 : vector<4x8x36xbf16> to vector<32x36xbf16>
    %c0_55 = arith.constant 0 : index
    %c0_56 = arith.constant 0 : index
    %68 = vector.load %arg8[%c0_55, %c0_56] : memref<36x4xbf16, #tpu.memory_space<vmem>>, vector<36x4xbf16>
    %cst_57 = arith.constant dense<0.000000e+00> : vector<32x4xf32>
    %69 = tpu.matmul %67, %68, %cst_57 {dimension_numbers = #tpu.dot_dimension_numbers<[1], [0], [0], [1], [0, 0, 1, 1], [], []>} : vector<32x36xbf16>, vector<36x4xbf16>, vector<32x4xf32> -> vector<32x4xf32>
    %c0_58 = arith.constant 0 : index
    %c0_59 = arith.constant 0 : index
    %70 = vector.load %arg9[%c0_58, %c0_59] : memref<1x4xf32, #tpu.memory_space<vmem>>, vector<1x4xf32>
    %71 = vector.broadcast %70 : vector<1x4xf32> to vector<32x4xf32>
    %72 = arith.addf %69, %71 : vector<32x4xf32>
    %cst_60 = arith.constant 0.000000e+00 : f32
    %73 = vector.broadcast %cst_60 : f32 to vector<32x4xf32>
    %74 = arith.maximumf %72, %73 : vector<32x4xf32>
    %75 = arith.truncf %74 : vector<32x4xf32> to vector<32x4xbf16>
    %c0_61 = arith.constant 0 : index
    %c0_62 = arith.constant 0 : index
    %76 = vector.load %arg10[%c0_61, %c0_62] : memref<4x16xbf16, #tpu.memory_space<vmem>>, vector<4x16xbf16>
    %cst_63 = arith.constant dense<0.000000e+00> : vector<32x16xf32>
    %77 = tpu.matmul %75, %76, %cst_63 {dimension_numbers = #tpu.dot_dimension_numbers<[1], [0], [0], [1], [0, 0, 1, 1], [], []>} : vector<32x4xbf16>, vector<4x16xbf16>, vector<32x16xf32> -> vector<32x16xf32>
    %c0_64 = arith.constant 0 : index
    %c0_65 = arith.constant 0 : index
    %78 = vector.load %arg11[%c0_64, %c0_65] : memref<1x16xf32, #tpu.memory_space<vmem>>, vector<1x16xf32>
    %79 = vector.broadcast %78 : vector<1x16xf32> to vector<32x16xf32>
    %80 = arith.addf %77, %79 : vector<32x16xf32>
    %81 = arith.addf %80, %43 : vector<32x16xf32>
    %cst_66 = arith.constant 0.000000e+00 : f32
    %82 = vector.broadcast %cst_66 : f32 to vector<32x16xf32>
    %83 = arith.maximumf %81, %82 : vector<32x16xf32>
    %84 = vector.shape_cast %83 : vector<32x16xf32> to vector<1x4x8x16xf32>
    %c0_67 = arith.constant 0 : index
    %c0_68 = arith.constant 0 : index
    %c0_69 = arith.constant 0 : index
    %c0_70 = arith.constant 0 : index
    %85 = vector.load %arg12[%c0_67, %c0_68, %c0_69, %c0_70] : memref<1x4x8x16xf32, #tpu.memory_space<vmem>>, vector<1x4x8x16xf32>
    tpu.vector_store %arg12[%c0_67, %c0_68, %c0_69, %c0_70], %84 {strides = array<i32>} : memref<1x4x8x16xf32, #tpu.memory_space<vmem>>, vector<1x4x8x16xf32>,
    return
  }
  func.func @transform_0(%arg0: i32, %arg1: i32) -> (i32, i32, i32, i32, i32) {
    %c0_i32 = arith.constant 0 : i32
    %c0_i32_0 = arith.constant 0 : i32
    %c0_i32_1 = arith.constant 0 : i32
    %c0_i32_2 = arith.constant 0 : i32
    return %arg0, %c0_i32, %arg1, %c0_i32_0, %c0_i32_1 : i32, i32, i32, i32, i32
  }
  func.func @transform_1(%arg0: i32, %arg1: i32) -> (i32, i32, i32, i32, i32) {
    %c0_i32 = arith.constant 0 : i32
    %c0_i32_0 = arith.constant 0 : i32
    %c0_i32_1 = arith.constant 0 : i32
    %c0_i32_2 = arith.constant 0 : i32
    return %arg0, %arg1, %c0_i32, %c0_i32_0, %c0_i32_1 : i32, i32, i32, i32, i32
  }
  func.func @transform_2(%arg0: i32, %arg1: i32) -> (i32, i32) {
    %c0_i32 = arith.constant 0 : i32
    %c0_i32_0 = arith.constant 0 : i32
    %c0_i32_1 = arith.constant 0 : i32
    return %c0_i32, %c0_i32_0 : i32, i32
  }
  func.func @transform_3(%arg0: i32, %arg1: i32) -> (i32, i32) {
    %c0_i32 = arith.constant 0 : i32
    %c0_i32_0 = arith.constant 0 : i32
    %c0_i32_1 = arith.constant 0 : i32
    return %c0_i32, %c0_i32_0 : i32, i32
  }
  func.func @transform_4(%arg0: i32, %arg1: i32) -> (i32, i32) {
    %c0_i32 = arith.constant 0 : i32
    %c0_i32_0 = arith.constant 0 : i32
    %c0_i32_1 = arith.constant 0 : i32
    return %c0_i32, %c0_i32_0 : i32, i32
  }
  func.func @transform_5(%arg0: i32, %arg1: i32) -> (i32, i32) {
    %c0_i32 = arith.constant 0 : i32
    %c0_i32_0 = arith.constant 0 : i32
    %c0_i32_1 = arith.constant 0 : i32
    return %c0_i32, %c0_i32_0 : i32, i32
  }
  func.func @transform_6(%arg0: i32, %arg1: i32) -> (i32, i32) {
    %c0_i32 = arith.constant 0 : i32
    %c0_i32_0 = arith.constant 0 : i32
    %c0_i32_1 = arith.constant 0 : i32
    return %c0_i32, %c0_i32_0 : i32, i32
  }
  func.func @transform_7(%arg0: i32, %arg1: i32) -> (i32, i32) {
    %c0_i32 = arith.constant 0 : i32
    %c0_i32_0 = arith.constant 0 : i32
    %c0_i32_1 = arith.constant 0 : i32
    return %c0_i32, %c0_i32_0 : i32, i32
  }
  func.func @transform_8(%arg0: i32, %arg1: i32) -> (i32, i32) {
    %c0_i32 = arith.constant 0 : i32
    %c0_i32_0 = arith.constant 0 : i32
    %c0_i32_1 = arith.constant 0 : i32
    return %c0_i32, %c0_i32_0 : i32, i32
  }
  func.func @transform_9(%arg0: i32, %arg1: i32) -> (i32, i32) {
    %c0_i32 = arith.constant 0 : i32
    %c0_i32_0 = arith.constant 0 : i32
    %c0_i32_1 = arith.constant 0 : i32
    return %c0_i32, %c0_i32_0 : i32, i32
  }
  func.func @transform_10(%arg0: i32, %arg1: i32) -> (i32, i32, i32, i32) {
    %c0_i32 = arith.constant 0 : i32
    %c0_i32_0 = arith.constant 0 : i32
    %c0_i32_1 = arith.constant 0 : i32
    return %arg0, %arg1, %c0_i32, %c0_i32_0 : i32, i32, i32, i32
  }
}

</mosaic_0001>

<bundles_post_ra>
// kernel: tpu_custom_call.1
= control target key start
LH: loop header
LB: loop body
LE: loop exit
PB: predicated region body
PF: predicated region fallthrough
CT: control target
= control target key end

     0   :  { %s2340_s0 = inlined_call_operand.hbm [shape: bf16[2,4,8,8,8], index: 0, kind: input, shape index: {}]   ;;  %s2341_s1 = inlined_call_operand.hbm [shape: bf16[2,2,2,8,8], index: 1, kind: input, shape index: {}]   ;;  %s2342_s2 = inlined_call_operand.vmem [shape: bf16[8,4], index: 2, kind: input, shape index: {}]   ;;  %s2343_s3 = inlined_call_operand.vmem [shape: f32[1,4], index: 3, kind: input, shape index: {}]   ;;  %s2344_s4 = inlined_call_operand.vmem [shape: bf16[8,16], index: 4, kind: input, shape index: {}]   ;;  %s2345_s5 = inlined_call_operand.vmem [shape: f32[1,16], index: 5, kind: input, shape index: {}]   ;;  %s2346_s6 = inlined_call_operand.vmem [shape: bf16[36,4], index: 6, kind: input, shape index: {}]   ;;  %s2347_s7 = inlined_call_operand.vmem [shape: f32[1,4], index: 7, kind: input, shape index: {}]   ;;  %s2348_s8 = inlined_call_operand.vmem [shape: bf16[4,16], index: 8, kind: input, shape index: {}]   ;;  %s2349_s9 = inlined_call_operand.vmem [shape: f32[1,16], index: 9, kind: input, shape index: {}]   ;;  %s2350_s10 = inlined_call_operand.hbm [shape: f32[2,8,8,16], index: 10, kind: output, shape index: {}]  }
   0x1   :  { %2360 = sst [smem:[#allocation23_spill]] %s2345_s5 }
   0x2   :  { %2361 = sst [smem:[#allocation24_spill]] %s2349_s9 }
   0x3   :  { %2362 = sst [smem:[#allocation25_spill]] %s2350_s10 }
   0x4   :  { %15 = vsyncpa [#allocation4], 0 }
   0x5   :  { %17 = vsyncpa [#allocation4 + $0x1], 0 }
   0x6   :  { %18 = vsyncpa [#allocation7], 0 }
   0x7   :  { %20 = vsyncpa [#allocation7 + $0x1], 0 }
   0x8   :  { %21 = vsyncpa [#allocation5], 0 }
   0x9   :  { %23 = vsyncpa [#allocation5 + $0x1], 0  ;;  %s1937_s13 = smov 0   ;;  %s1939_s14 = smov 0  }
   0xa   :  { %s1941_s15 = smov 0   ;;  %s1943_s16 = smov 0  }
   0xb   :  { %s1945_s17 = smov 0   ;;  %s1947_s18 = smov 0  }
   0xc   :  { %s1949_s19 = smov 0   ;;  %s1951_s20 = smov 0  }
   0xd LB: > { %2363 = sst [smem:[#allocation15_spill]] %s1832_s13  ;;  %s1439_s21 = sadd.s32 4294967295, %s1860_s20   ;;  %s1860_s20 = sphi %s1951_s20, %s29_s20   ;;  %s1856_s19 = sphi %s1949_s19, %s2398_s19   ;;  %s1852_s18 = sphi %s1947_s18, %s2397_s18   ;;  %s1848_s17 = sphi %s1945_s17, %s2396_s17   ;;  %s1844_s16 = sphi %s1943_s16, %s2395_s16   ;;  %s1840_s15 = sphi %s1941_s15, %s2390_s15   ;;  %s1836_s14 = sphi %s1939_s14, %s2394_s14   ;;  %s1832_s13 = sphi %s1937_s13, %s2393_s13  }
   0xe   : > { %2364 = sst [smem:[#allocation16_spill]] %s1840_s15  ;;  %s1440_s22 = sadd.s32 4294967294, %s1860_s20  }
   0xf   : > { %2365 = sst [smem:[#allocation17_spill]] %s1848_s17  ;;  %s38_s23 = sadd.s32 1, %s1852_s18 }
  0x10   : > { %p39_p0 = scmp.ge.s32.totalorder %s38_s23, 2  ;;  %s41_s24 = sadd.s32 1, %s1856_s19 }
  0x11   : > { %p57_p1 = scmp.ne.s32.totalorder %s1840_s15, %s1836_s14  ;;  %p58_p2 = scmp.eq.s32.totalorder %s1860_s20, 0 }
  0x12   : > { %s2400_s23 = smov (%p39_p0, %s38_s23), 0  ;;  %s2402_s24 = smov (!%p39_p0, %s41_s24), %s1856_s19 }
  0x13   : > { %2366 = sst [smem:[#allocation18_spill]] %s2400_s23  ;;  %s46_s25 = ssub.s32 %s1852_s18, %s2400_s23 }
  0x14   : > { %p1989_p3 = por %p58_p2, %p57_p1  ;;  %p43_p4 = scmp.ge.s32.totalorder %s2402_s24, 2 }
  0x15   : > { %p63_p5 = scmp.ne.s32.totalorder %s1836_s14, %s1832_s13  ;;  %p64_p6 = scmp.eq.s32.totalorder %s1439_s21, 0 }
  0x16   : > { %p285_p7 = scmp.eq.s32.totalorder %s1439_s21, 3  ;;  %s2404_s24 = smov (%p43_p4, %s2402_s24), 0 }
  0x17   : > { %2368 = sst [smem:[#allocation19_spill]] %s2404_s24  ;;  %p1997_p8 = por %p64_p6, %p63_p5 }
  0x18   : > { %p2001_p9 = por %p285_p7, %p57_p1  ;;  %s45_s29 = ssub.s32 %s1856_s19, %s2404_s24 }
  0x19   : > { %p291_p10 = scmp.eq.s32.totalorder %s1440_s22, 3  ;;  %s47_s30 = sor.u32 %s46_s25, %s45_s29 }
  0x1a   : > { %s2370_s28 = scalar_select %p2001_p9, 1, 0 }
  0x1b   : > { %s50_s11 = sadd.s32 1, %s1840_s15  ;;  %p48_p11 = scmp.eq.s32.totalorder %s47_s30, 0 }
  0x1c   : > { %2371 = sst [smem:[#allocation20_spill]] %s2370_s28  ;;  %p2008_p12 = por %p291_p10, %p63_p5 }
  0x1d   : > { %s2013_s21 = scalar_select %p48_p11, %s1840_s15, %s50_s11  }
  0x1e   : > { %s2372_s12 = scalar_select %p2008_p12, 1, 0 }
  0x1f   : > { %2374 = sst [smem:[#allocation22_spill]] %s2013_s21  ;;  %p1442_p13 = scmp.ge.s32.totalorder %s1860_s20, 4 }
  0x20   : > { %2373 = sst [smem:[#allocation21_spill]] %s2372_s12 }
  0x21   : > { %331 = sbr.rel (%p1442_p13) target bundleno = 81 (0x51), region = 48 }
  0x28   : > { %s2017_s22 = sand.u32 1, %s1840_s15   ;;  %s1444_s25 = sshll.u32 %s1852_s18, 2 }
  0x29   : > { %s1443_s29 = sshll.u32 %s2017_s22, 6  ;;  %s1445_s30 = sshll.u32 %s1856_s19, 5 }
  0x2a   : > { %s345_s24 = sadd.s32 %s1445_s30, %s1444_s25  ;;  %s339_s11 = scalar_lea.vmem [#allocation3], %s1443_s29 }
  0x2b   : > { %s360_s23 = sshll.u32 %s339_s11, 4  ;;  %s1446_s21 = sshll.u32 %s345_s24, 6  ;;  %s361_s23 = int_to_ptr.vmem [resolvable:$true] %s360_s23 }
  0x2c   : > { %s1614_s12 = scalar_select %p1989_p3, [#allocation0], [#allocation11] }
  0x2d   : > { %s1862_s13 = smov 512   ;;  %s1863_s10 = smov 256  }
  0x2e   : > { %1615 = sst [smem:[#allocation10]] (%p1989_p3), %s1862_s13  ;;  %s1864_s28 = smov 4  }
  0x2f   : > { %s352_s15 = sld [smem:[%s1614_s12]]   ;;  %s1865_s25 = smov 64  }
  0x30   : > { %1616 = sst [smem:[#allocation10 + $0x1]] (%p1989_p3), %s1863_s10  ;;  %s347_s30 = scalar_lea.hbm %s2340_s0, %s1446_s21 }
  0x31   : > { %1617 = sst [smem:[#allocation10 + $0x2]] (%p1989_p3), %s1864_s28  ;;  %s336_s11 = scalar_lea.sflag [#allocation4], %s2017_s22 }
  0x32   : > { %1618 = sst [smem:[#allocation10 + $0x3]] (%p1989_p3), %s1865_s25  ;;  %s1866_s9 = smov [#allocation9]  }
  0x33   : > { %1619 = sst [smem:[#allocation10 + $0x4]] (%p1989_p3), %s1865_s25  ;;  %s1449_s10 = sshll.u32 %s2017_s22, 3 }
  0x34   : > { %1620 = sst [smem:[#allocation10 + $0x5]] (%p1989_p3), %s1864_s28  ;;  %s1450_s5 = sshll.u32 %s1852_s18, 1 }
  0x35   : > { %s1447_s13 = sshll.u32 %s352_s15, 26  ;;  %s1451_s17 = sshll.u32 %s1856_s19, 2 }
  0x36   : > { %s1448_s12 = sadd.s32 134217728, %s1447_s13  ;;  %s387_s29 = scalar_lea.vmem [#allocation6], %s1449_s10 }
  0x37   : > { %1621 = dma.general (%p1989_p3), %s347_s30, 1024, %s361_s23, %s336_s11, %s1866_s9, [#allocation10], %s1448_s12, 0  }
  0x38   : > { %s396_s21 = sshll.u32 %s387_s29, 4  ;;  %s393_s24 = sadd.s32 %s1451_s17, %s1450_s5  ;;  %s2045_s21 = int_to_ptr.vmem [resolvable:$true] %s396_s21 }
  0x39   : > { %s1452_s28 = sshll.u32 %s393_s24, 6  ;;  %s384_s9 = scalar_lea.sflag [#allocation7], %s2017_s22 }
  0x3a   : > { %s2050_s13 = scalar_lea.hbm %s2341_s1, %s1452_s28  ;;  %s1734_s17 = scalar_lea.hbm %s2341_s1, 512 }
  0x3b   : > { %s1730_s23 = scalar_lea.hbm %s2050_s13, 128  ;;  %p1735_p4 = scmp.lt.u32.totalorder %s2050_s13, %s2341_s1 }
  0x3c   : > { %p1731_p0 = scmp.ne.s32.totalorder %s2050_s13, %s1730_s23  ;;  %p1736_p5 = scmp.lt.u32.totalorder %s1734_s17, %s1730_s23 }
  0x3d   : > { %p1738_p7 = scmp.lt.u32.totalorder %s1730_s23, %s2050_s13 }
  0x3e   : > { %p1732_p1 = pnand %p1731_p0, %p1989_p3  ;;  %p1737_p6 = por %p1736_p5, %p1735_p4 }
  0x40   : > { %p1733_p2 = pneg %p1732_p1  ;;  %p1739_p10 = por %p1738_p7, %p1737_p6 }
  0x42   : > { %p1740_p11 = pnand %p1739_p10, %p1733_p2 }
  0x44   : > { %1743 = shalt.err (!%p1740_p11)
}
  0x45   : > { %s1744_s10 = scalar_lea.vmem %s2045_s21, 128  ;;  %s1867_s29 = smov [#allocation6]  }
  0x46   : > { %p1745_p13 = scmp.ne.s32.totalorder %s2045_s21, %s1744_s10  ;;  %s1748_s24 = sshll.u32 %s1867_s29, 4  ;;  %s1749_s24 = int_to_ptr.vmem [resolvable:$false] %s1748_s24 }
  0x47   : > { %s1750_s28 = scalar_lea.vmem %s1749_s24, 256  ;;  %p1751_p12 = scmp.lt.s32.totalorder %s2045_s21, %s1749_s24 }
  0x48   : > { %p1746_p0 = pnand %p1745_p13, %p1989_p3  ;;  %p1752_p9 = scmp.lt.s32.totalorder %s1750_s28, %s1744_s10 }
  0x4a   : > { %p1747_p1 = pneg %p1746_p0  ;;  %p1753_p4 = por %p1752_p9, %p1751_p12 }
  0x4c   : > { %p1754_p5 = pnand %p1753_p4, %p1747_p1 }
  0x4e   : > { %1757 = shalt.err (!%p1754_p5)
}
  0x4f   : > { %s1868_s15 = smov 64   ;;  %s1869_s25 = smov 4  }
  0x50   : > { %1622 = dma.hbm_to_vmem [thread:$0]  (%p1989_p3), %s2050_s13, 128, %s2045_s21, %s384_s9, %s1868_s15, %s1868_s15, %s1869_s25  }
  0x51 PF: > { %p1453_p2 = scmp.ge.s32.totalorder %s1860_s20, 1  ;;  %p404_p6 = scmp.lt.s32.totalorder %s1860_s20, 5 }
  0x53   : > { %p405_p7 = pnand %p1453_p2, %p404_p6 }
  0x54   : > { %s2079_s23 = sand.u32 (!%p405_p7), 1, %s1836_s14  }
  0x55   : > { %408 = sbr.rel (%p405_p7) target bundleno = 964 (0x3c4), region = 60  ;;  %s1454_s30 = sshll.u32 (!%p405_p7), %s2079_s23, 6 }
  0x56   : > { %s411_s5 = scalar_lea.sflag (!%p405_p7), [#allocation4], %s2079_s23  ;;  %s2083_s17 = scalar_lea.vmem (!%p405_p7), [#allocation3], %s1454_s30 }
  0x5c   : > { %1819 = dma.done.wait (%p1997_p8), %s411_s5, 1024  }
  0x5d   : > { %1821 = vsyncadd (%p1997_p8), %s411_s5, 4294966272  ;;  %s1455_s26 = sshll.u32 %s2079_s23, 3  ;;  %s420_s22 = scalar_lea.sflag [#allocation7], %s2079_s23 }
  0x5e   : > { %s423_s21 = scalar_lea.vmem [#allocation6], %s1455_s26 }
  0x5f   : > { %1823 = dma.done.wait (%p1997_p8), %s420_s22, 128  }
  0x60   : > { %1825 = vsyncadd (%p1997_p8), %s420_s22, 4294967168  ;;  %v1870_v0 = vmov 0.0   ;;  %vm1871_vm0 = vmmov 0   ;;  %vm557_vm1 = vcmask 1043456   ;;  %vm532_vm2 = vcmask 64512   ;;  %v1714_v3 = vld [vmem:[%s2083_s17] sm:$0xff]  }
  0x61   : > { %1582 = vmatprep.subr.bf16.mxu1 %v1870_v0  ;;  %1584 = vmatprep.mubr.msk.bf16.mxu1 %vm1871_vm0, %v1870_v0  ;;  %v484_v1 = vld [vmem:[%s2342_s2] sm:$0xf]  ;;  %v1715_v4 = vld [vmem:[%s2083_s17 + $0x8] sm:$0xff]   ;;  %v1718_v7 = vld [vmem:[%s2083_s17 + $0x18] sm:$0xff]   ;;  %p775_p3 = scmp.eq.s32.totalorder %s1844_s16, 0  ;;  %s1872_s10 = smov 16  }
  0x62   : > { %1610 = vmatprep.subr.msk.bf16.mxu0 %vm557_vm1, %v484_v1  ;;  %v559_v2 = vsel %vm557_vm1, %v484_v1, 0  ;;  %1566 = vmatprep.mubr.msk.bf16.mxu0 %vm532_vm2, %v1714_v3  ;;  %v1716_v5 = vld [vmem:[%s423_s21] sm:$0xff]   ;;  %v1717_v6 = vld [vmem:[%s2083_s17 + $0x10] sm:$0xff]   ;;  %v1722_v11 = vld [vmem:[%s2083_s17 + $0x38] sm:$0xff]   ;;  %vm903_vm4 = vcmask 1040384   ;;  %s1873_s29 = smov 4  }
  0x63   : > { %1565 = vmatpush3.bf16.msra.mxu0 %v559_v2  ;;  %1583 = vmatpush3.bf16.msra.mxu1 %v559_v2  ;;  %v1719_v8 = vld [vmem:[%s2083_s17 + $0x20] sm:$0xff]   ;;  %v1720_v9 = vld [vmem:[%s2083_s17 + $0x28] sm:$0xff]   ;;  %v1721_v10 = vld [vmem:[%s2083_s17 + $0x30] sm:$0xff]   ;;  %s776_s27 = scalar_select %p775_p3, 1, 0  ;;  %vm910_vm7 = vcmask 27648  }
  0x64   : > { %v2121_v12 = vld [vmem:[%s2343_s3] ss:$0 sm:$0xff]  ;;  %vm904_vm5 = vsmask.f32 256  ;;  %s1874_s24 = smov 20   ;;  %s1875_s28 = smov 8  }
  0x65   : > { %v777_v13 = vstv %s776_s27  ;;  %vm2142_vm6 = vmand %vm903_vm4, %vm904_vm5  ;;  %s1876_s15 = smov 28   ;;  %s1877_s25 = smov 12   ;;  %vm1168_vm8 = vcmask 1041408   ;;  %vm927_vm9 = vcmask 60448   ;;  %vm944_vm10 = vcmask 93248  }
  0x66   : > { %1567 = vmatmul.mubr.msk.bf16.vlgmr.msra.gmra.mrb[0].mxu0 %vm532_vm2, %v1715_v4  ;;  %1585 = vmatmul.mubr.msk.bf16.vlgmr.msra.gmra.mrb[0].mxu1 %vm532_vm2, %v1716_v5  ;;  %vm2125_vm3 = vcmp.eq.s32.totalorder %v777_v13, 1  ;;  %s1878_s26 = smov 32   ;;  %s1879_s12 = smov 24   ;;  %vm1009_vm11 = vcmask 126048   ;;  %vm1026_vm12 = vcmask 158848   ;;  %vm1043_vm13 = vcmask 191648  }
  0x67   : > { %1570 = vmatprep.mubr.msk.bf16.mxu0 %vm532_vm2, %v1717_v6  ;;  %vm1081_vm14 = vcmask 224448   ;;  %vm1098_vm15 = vcmask 257248   ;;  %vm1115_vm0 = vcmask 290048   ;;  %s2380_s5 = sld [smem:[#allocation23_spill]]  ;;  %s2381_s21 = sld [smem:[#allocation24_spill]] }
  0x68   : > { %s1456_s9 = sshll.u32 %s2079_s23, 5  ;;  %s1880_s22 = smov [#allocation8]  }
  0x6e   : > { %1571 = vmatmul.mubr.msk.bf16.gmra.mrb[4].mxu0 %vm532_vm2, %v1718_v7 }
  0x6f   : > { %1574 = vmatprep.mubr.msk.bf16.mxu0 %vm532_vm2, %v1719_v8 }
  0x76   : > { %1575 = vmatmul.mubr.msk.bf16.gmra.mrb[8].mxu0 %vm532_vm2, %v1720_v9 }
  0x77   : > { %1578 = vmatprep.mubr.msk.bf16.mxu0 %vm532_vm2, %v1721_v10 }
  0x7e   : > { %1579 = vmatmul.mubr.msk.bf16.gmra.mrb[12].mxu0 %vm532_vm2, %v1722_v11 }
 0x139   : > { %v1568_v14 = vpop.f32.mrb[0].mxu0  ;;  %v766_v15 = vpop.f32.mrb[0].mxu1 }
 0x13a   : > { %v604_v16 = vadd.f32 %v1568_v14, %v2121_v12  ;;  %v595_v17 = vpop.f32.mrb[1].mxu0  ;;  %v767_v18 = vadd.f32 %v2121_v12, %v766_v15  ;;  %v1586_v19 = vpop.f32.mrb[1].mxu1 }
 0x13b   : > { %v1569_v21 = vpop.f32.mrb[2].mxu0  ;;  %v769_v22 = vpop.f32.mrb[2].mxu1  ;;  %v596_v29 = vadd.f32 %v2121_v12, %v595_v17 }
 0x13c   : > { %v660_v23 = vmax.f32 %v604_v16, 0.0  ;;  %v773_v24 = vmax.f32 %v767_v18, 0.0  ;;  %v607_v25 = vadd.f32 %v1569_v21, %v2121_v12  ;;  %v598_v26 = vpop.f32.mrb[3].mxu0  ;;  %v770_v27 = vadd.f32 %v2121_v12, %v769_v22  ;;  %v1587_v28 = vpop.f32.mrb[3].mxu1 }
 0x13d   : > { %v599_v30 = vadd.f32 %v2121_v12, %v598_v26  ;;  %v658_v41 = vmax.f32 %v596_v29, 0.0 }
 0x13e   : > { %v779_v31 = vsel %vm2125_vm3, 0.0, %v773_v24  ;;  %v661_v32 = vmax.f32 %v607_v25, 0.0  ;;  %v774_v33 = vmax.f32 %v770_v27, 0.0  ;;  %v1526_v34 = vpack.c.bf16 %v660_v23, %v660_v23 }
 0x13f   : > { %v1540_v35 = vpack.c.bf16 %v779_v31, %v779_v31  ;;  %v659_v36 = vmax.f32 %v599_v30, 0.0  ;;  %v1524_v52 = vpack.c.bf16 %v658_v41, %v658_v41 }
 0x140   : > { %v780_v37 = vsel %vm2125_vm3, 0.0, %v774_v33  ;;  %1018 = vrot.lane.b32.xlu0 %v1526_v34, %s1872_s10  ;;  %v1527_v38 = vpack.c.bf16 %v661_v32, %v661_v32  ;;  %vm1302_vm3 = vcmask 130048  }
 0x141   : > { %v1541_v39 = vpack.c.bf16 %v780_v37, %v780_v37  ;;  %v1572_v40 = vpop.f32.mrb[4].mxu0  ;;  %v1525_v47 = vpack.c.bf16 %v659_v36, %v659_v36 }
 0x142   : > { %1020 = vrot.lane.b32.xlu1 %v1527_v38, %s1872_s10  ;;  %v611_v42 = vpop.f32.mrb[5].mxu0  ;;  %v620_v45 = vadd.f32 %v1572_v40, %v2121_v12 }
 0x143   : > { %v872_v43 = vshrl.u32 %v1541_v39, 16  ;;  %v875_v44 = vshll.u32 %v1541_v39, 16  ;;  %v1573_v46 = vpop.f32.mrb[6].mxu0  ;;  %v612_v61 = vadd.f32 %v2121_v12, %v611_v42 }
 0x144   : > { %v623_v48 = vadd.f32 %v1573_v46, %v2121_v12  ;;  %915 = vrot.lane.b32.xlu0 %v1540_v35, %s1873_s29  ;;  %v614_v49 = vpop.f32.mrb[7].mxu0  ;;  %v664_v56 = vmax.f32 %v620_v45, 0.0 }
 0x145   : > { %v874_v50 = vrot.slane %v872_v43, 7  ;;  %v615_v51 = vadd.f32 %v2121_v12, %v614_v49  ;;  %v662_v7 = vmax.f32 %v612_v61, 0.0 }
 0x146   : > { %v665_v53 = vmax.f32 %v623_v48, 0.0  ;;  %1016 = vrot.lane.b32.xlu1 %v1525_v47, %s1872_s10  ;;  %v1530_v0 = vpack.c.bf16 %v664_v56, %v664_v56 }
 0x147   : > { %v877_v55 = vor.u32 %v875_v44, %v874_v50  ;;  %v663_v58 = vmax.f32 %v615_v51, 0.0  ;;  %v1528_v15 = vpack.c.bf16 %v662_v7, %v662_v7 }
 0x148   : > { %v1531_v57 = vpack.c.bf16 %v665_v53, %v665_v53  ;;  %1014 = vrot.lane.b32.xlu0 %v1524_v52, %s1872_s10  ;;  %v964_v9 = vshrl.u32 %v1530_v0, 16  ;;  %v967_v29 = vshll.u32 %v1530_v0, 16 }
 0x149   : > { %v1576_v59 = vpop.f32.mrb[8].mxu0  ;;  %v906_v60 = vsel %vm2142_vm6, 0, %v877_v55  ;;  %v2152_v3 = vpack.c.bf16 %v663_v58, %v663_v58  ;;  %v950_v32 = vshrl.u32 %v1528_v15, 16  ;;  %v953_v55 = vshll.u32 %v1528_v15, 16 }
 0x14a   : > { %v636_v62 = vadd.f32 %v1576_v59, %v2121_v12  ;;  %v627_v63 = vpop.f32.mrb[9].mxu0  ;;  %1037 = vrot.lane.b32.xlu1 %v1531_v57, %s1874_s24  ;;  %911 = vst.msk [vmem:[#allocation2] sm:$0xf] %vm910_vm7, %v906_v60  ;;  %v971_v2 = vshrl.u32 %v1531_v57, 16  ;;  %v974_v16 = vshll.u32 %v1531_v57, 16  ;;  %v966_v20 = vrot.slane %v964_v9, 7 }
 0x14b   : > { %v1577_v1 = vpop.f32.mrb[10].mxu0  ;;  %v628_v17 = vadd.f32 %v2121_v12, %v627_v63  ;;  %v957_v21 = vshrl.u32 %v2152_v3, 16  ;;  %v952_v47 = vrot.slane %v950_v32, 7  ;;  %v960_v48 = vshll.u32 %v2152_v3, 16 }
 0x14c   : > { %v668_v4 = vmax.f32 %v636_v62, 0.0  ;;  %v639_v5 = vadd.f32 %v1577_v1, %v2121_v12  ;;  %v630_v6 = vpop.f32.mrb[11].mxu0  ;;  %932 = vrot.lane.b32.xlu0 %v1541_v39, %s1875_s28  ;;  %v973_v10 = vrot.slane %v971_v2, 7  ;;  %v969_v37 = vor.u32 %v967_v29, %v966_v20  ;;  %v1726_v20 = vld [vmem:[%s2346_s6 + $0x8] sm:$0xff]  }
 0x14d   : > { %v631_v13 = vadd.f32 %v2121_v12, %v630_v6  ;;  %v666_v33 = vmax.f32 %v628_v17, 0.0  ;;  %v959_v35 = vrot.slane %v957_v21, 7  ;;  %v1727_v21 = vld [vmem:[%s2346_s6 + $0x10] ss:$0 sps:$4 sm:$0x33]  }
 0x14e   : > { %v1534_v8 = vpack.c.bf16 %v668_v4, %v668_v4  ;;  %1033 = vrot.lane.b32.xlu1 %v2152_v3, %s1874_s24  ;;  %v669_v11 = vmax.f32 %v639_v5, 0.0  ;;  %v976_v27 = vor.u32 %v974_v16, %v973_v10  ;;  %v983_v51 = vsel %vm2142_vm6, 0, %v969_v37  ;;  %v791_v10 = vld [vmem:[%s2344_s4] sm:$0xf]  ;;  %v1724_v16 = vld [vmem:[%s2083_s17 + $0x8] sm:$0xff]  }
 0x14f   : > { %v667_v25 = vmax.f32 %v631_v13, 0.0  ;;  %v1532_v49 = vpack.c.bf16 %v666_v33, %v666_v33  ;;  %v962_v59 = vor.u32 %v960_v48, %v959_v35  ;;  %v1501_v62 = vcombine.low %v983_v51, %v983_v51  ;;  %1611 = vmatprep.subr.msk.bf16.mxu1 %vm557_vm1, %v791_v10 }
 0x150   : > { %1035 = vrot.lane.b32.xlu0 %v1530_v0, %s1874_s24  ;;  %v1535_v24 = vpack.c.bf16 %v669_v11, %v669_v11  ;;  %v984_v40 = vsel %vm2142_vm6, 0, %v976_v27  ;;  %v955_v0 = vor.u32 %v953_v55, %v952_v47  ;;  %v816_v11 = vsel %vm557_vm1, %v791_v10, 0 }
 0x151   : > { %v1580_v14 = vpop.f32.mrb[12].mxu0  ;;  %v1533_v39 = vpack.c.bf16 %v667_v25, %v667_v25  ;;  %v1502_v56 = vcombine.low %v984_v40, %v984_v40  ;;  %v982_v4 = vsel %vm2142_vm6, 0, %v962_v59  ;;  %1589 = vmatpush3.bf16.msra.mxu1 %v816_v11  ;;  %v1170_v54 = vsel %vm1168_vm8, %v1727_v21, 0 }
 0x152   : > { %921 = vrot.lane.b32.xlu1 %v1534_v8, %s1873_s29  ;;  %v652_v18 = vadd.f32 %v1580_v14, %v2121_v12  ;;  %v643_v19 = vpop.f32.mrb[13].mxu0  ;;  %v981_v6 = vsel %vm2142_vm6, 0, %v955_v0  ;;  %v1500_v7 = vcombine.low %v982_v4, %v982_v4  ;;  %vm1161_vm1 = vcmask 293888   ;;  %v1227_v0 = vld [vmem:[%s2348_s8] sm:$0x3] }
 0x153   : > { %v644_v22 = vadd.f32 %v2121_v12, %v643_v19  ;;  %v1581_v23 = vpop.f32.mrb[14].mxu0  ;;  %v1499_v9 = vcombine.low %v981_v6, %v981_v6 }
 0x154   : > { %1031 = vrot.lane.b32.xlu0 %v1528_v15, %s1874_s24  ;;  %v672_v26 = vmax.f32 %v652_v18, 0.0  ;;  %v646_v28 = vpop.f32.mrb[15].mxu0  ;;  %v655_v43 = vadd.f32 %v1581_v23, %v2121_v12  ;;  %v1723_v15 = vld [vmem:[%s2083_s17] sm:$0xff]   ;;  %v1725_v18 = vld [vmem:[%s2346_s6] sm:$0xff]   ;;  %s1519_s17 = sshll.u32 %s1844_s16, 2  ;;  %s2382_s16 = sld [smem:[#allocation20_spill]] }
 0x155   : > { %v670_v30 = vmax.f32 %v644_v22, 0.0  ;;  %v647_v31 = vadd.f32 %v2121_v12, %v646_v28  ;;  %1590 = vmatprep.mubr.msk.bf16.mxu1 %vm532_vm2, %v1723_v15  ;;  %1594 = vmatprep.subr.bf16.mxu1 %v1725_v18 }
 0x156   : > { %1092 = vrot.lane.b32.xlu1 %v1535_v24, %s1876_s15  ;;  %v2168_v34 = vpack.c.bf16 %v672_v26, %v672_v26  ;;  %v673_v58 = vmax.f32 %v655_v43, 0.0  ;;  %1591 = vmatmul.mubr.msk.bf16.vlgmr.msra.gmra.mrb[4].mxu1 %vm532_vm2, %v1724_v16  ;;  %vm1235_vm2 = vcmask 31744  }
 0x157   : > { %v2170_v36 = vpack.c.bf16 %v670_v30, %v670_v30  ;;  %v671_v38 = vmax.f32 %v647_v31, 0.0  ;;  %1595 = vmatpush3.bf16.msra.mxu1 %v1725_v18  ;;  %v1494_v18 = vld [vmem:[%s2380_s5] ss:$0 sm:$0xff]  ;;  %s1308_s5 = scalar_lea.sflag [#allocation5], %s2079_s23 }
 0x158   : > { %1090 = vrot.lane.b32.xlu0 %v1534_v8, %s1876_s15  ;;  %v893_v41 = vshrl.u32 %v2168_v34, 16  ;;  %v896_v42 = vshll.u32 %v2168_v34, 16  ;;  %v1539_v3 = vpack.c.bf16 %v673_v58, %v673_v58  ;;  %1596 = vmatprep.subr.bf16.mxu1 %v1726_v20 }
 0x159   : > { %v2178_v44 = vpack.c.bf16 %v671_v38, %v671_v38  ;;  %v879_v45 = vshrl.u32 %v2170_v36, 16  ;;  %v882_v46 = vshll.u32 %v2170_v36, 16 }
 0x15a   : > { %919 = vrot.lane.b32.xlu1 %v1533_v39, %s1873_s29  ;;  %v895_v50 = vrot.slane %v893_v41, 7  ;;  %v1049_v8 = vshrl.u32 %v1539_v3, 16  ;;  %v1052_v14 = vshll.u32 %v1539_v3, 16  ;;  %p2385_p9 = scmp.ne.s32.totalorder %s2382_s16, 0 }
 0x15b   : > { %v881_v52 = vrot.slane %v879_v45, 7  ;;  %v886_v53 = vshrl.u32 %v2178_v44, 16  ;;  %v889_v12 = vshll.u32 %v2178_v44, 16  ;;  %1597 = vmatpush3.bf16.msra.mxu1 %v1726_v20 }
 0x15c   : > { %917 = vrot.lane.b32.xlu0 %v1532_v49, %s1873_s29  ;;  %v898_v57 = vor.u32 %v896_v42, %v895_v50  ;;  %v1051_v13 = vrot.slane %v1049_v8, 7  ;;  %1612 = vmatprep.subr.msk.bf16.mxu1 %vm1168_vm8, %v1727_v21  ;;  %v1515_v21 = vld [vmem:[%s2381_s21] ss:$0 sm:$0xff]  ;;  %s1762_s21 = sshll.u32 %s1880_s22, 4  ;;  %s1763_s21 = int_to_ptr.vmem [resolvable:$false] %s1762_s21 }
 0x15d   : > { %v884_v60 = vor.u32 %v882_v46, %v881_v52  ;;  %v888_v61 = vrot.slane %v886_v53, 7 }
 0x15e   : > { %1003 = vrot.lane.b32.xlu1 %v1502_v56, %s1877_s25  ;;  %v909_v63 = vsel %vm2142_vm6, 0, %v898_v57  ;;  %v1054_v17 = vor.u32 %v1052_v14, %v1051_v13 }
 0x15f   : > { %914 = vst.msk [vmem:[#allocation2 + $0xc] sm:$0xf] %vm910_vm7, %v909_v63  ;;  %v907_v1 = vsel %vm2142_vm6, 0, %v884_v60  ;;  %v891_v2 = vor.u32 %v889_v12, %v888_v61  ;;  %v1505_v22 = vcombine.low %v909_v63, %v909_v63  ;;  %1599 = vmatpush3.bf16.msra.mxu1 %v1170_v54 }
 0x160   : > { %1001 = vrot.lane.b32.xlu0 %v1501_v62, %s1877_s25  ;;  %912 = vst.msk [vmem:[#allocation2 + $0x4] sm:$0xf] %vm910_vm7, %v907_v1  ;;  %v1056_v19 = vsel %vm2142_vm6, 0, %v1054_v17  ;;  %v1503_v24 = vcombine.low %v907_v1, %v907_v1  ;;  %1613 = vmatprep.subr.msk.bf16.mxu1 %vm1168_vm8, %v1227_v0  ;;  %v1243_v1 = vsel %vm1168_vm8, %v1227_v0, 0 }
 0x161   : > { %v908_v5 = vsel %vm2142_vm6, 0, %v891_v2  ;;  %v1506_v23 = vcombine.low %v1056_v19, %v1056_v19  ;;  %v1507_v2 = vld [vmem:[%s2347_s7] ss:$0 sm:$0xff] }
 0x162   : > { %1088 = vrot.lane.b32.xlu1 %v1533_v39, %s1876_s15  ;;  %913 = vst.msk [vmem:[#allocation2 + $0x8] sm:$0xf] %vm910_vm7, %v908_v5  ;;  %v1504_v25 = vcombine.low %v908_v5, %v908_v5 }
 0x164   : > { %1086 = vrot.lane.b32.xlu0 %v1532_v49, %s1876_s15  ;;  %s2379_s15 = sld [smem:[#allocation17_spill]] }
 0x166   : > { %999 = vrot.lane.b32.xlu1 %v1500_v7, %s1877_s25 }
 0x168   : > { %997 = vrot.lane.b32.xlu0 %v1499_v9, %s1877_s25 }
 0x16a   : > { %938 = vrot.lane.b32.xlu1 %v2168_v34, %s1875_s28  ;;  %s1520_s13 = sshll.u32 %s2379_s15, 3  ;;  %s2383_s15 = sld [smem:[#allocation25_spill]] }
 0x16b   : > { %s1320_s27 = sadd.s32 %s1520_s13, %s1519_s17  ;;  %s1764_s17 = scalar_lea.vmem %s1763_s21, 1024 }
 0x16c   : > { %1103 = vrot.lane.b32.xlu0 %v2170_v36, %s1878_s26  ;;  %s1521_s10 = sshll.u32 %s1320_s27, 7 }
 0x16e   : > { %934 = vrot.lane.b32.xlu1 %v2170_v36, %s1875_s28 }
 0x170   : > { %936 = vrot.lane.b32.xlu0 %v2178_v44, %s1875_s28  ;;  %s2384_s25 = smov %s2383_s15  ;;  %s2283_s30 = scalar_lea.hbm %s2383_s15, %s1521_s10 }
 0x172   : > { %1105 = vrot.lane.b32.xlu1 %v2178_v44, %s1878_s26 }
 0x174   : > { %1073 = vrot.lane.b32.xlu0 %v1505_v22, %s1879_s12 }
 0x176   : > { %1075 = vrot.lane.b32.xlu1 %v1506_v23, %s1879_s12 }
 0x178   : > { %1069 = vrot.lane.b32.xlu0 %v1503_v24, %s1879_s12 }
 0x17a   : > { %1071 = vrot.lane.b32.xlu1 %v1504_v25, %s1879_s12  ;;  %s464_s12 = scalar_lea.vmem [#allocation8], %s1456_s9 }
 0x17b   : > { %s1323_s11 = sshll.u32 %s464_s12, 4  ;;  %s2277_s11 = int_to_ptr.vmem [resolvable:$true] %s1323_s11 }
 0x17c   : > { %1107 = vrot.lane.b32.xlu0 %v2168_v34, %s1878_s26  ;;  %p1765_p11 = scmp.lt.s32.totalorder %s2277_s11, %s1763_s21 }
 0x17e   : > { %1109 = vrot.lane.b32.xlu1 %v1539_v3, %s1878_s26  ;;  %s1758_s26 = scalar_lea.vmem %s2277_s11, 512 }
 0x17f   : > { %p1759_p8 = scmp.ne.s32.totalorder %s2277_s11, %s1758_s26  ;;  %p1766_p13 = scmp.lt.s32.totalorder %s1764_s17, %s1758_s26 }
 0x181   : > { %p1760_p12 = pnand %p1759_p8, %p2385_p9  ;;  %p1767_p0 = por %p1766_p13, %p1765_p11 }
 0x183   : > { %p1761_p10 = pneg %p1760_p12 }
 0x185   : > { %p1768_p1 = pnand %p1767_p0, %p1761_p10 }
 0x1b2   : > { %v1019_v26 = vpop.permute.xlu0 %1018 }
 0x1b4   : > { %v1021_v27 = vpop.permute.xlu1 %1020 }
 0x1b6   : > { %v916_v28 = vpop.permute.xlu0 %915 }
 0x1b7   : > { %928 = vst.msk [vmem:[#allocation2] sm:$0xf] %vm927_vm9, %v916_v28 }
 0x1b8   : > { %v1017_v29 = vpop.permute.xlu1 %1016 }
 0x1ba   : > { %v1015_v30 = vpop.permute.xlu0 %1014 }
 0x1bc   : > { %v1038_v31 = vpop.permute.xlu1 %1037 }
 0x1be   : > { %v933_v32 = vpop.permute.xlu0 %932 }
 0x1bf   : > { %945 = vst.msk [vmem:[#allocation2] sm:$0xf] %vm944_vm10, %v933_v32 }
 0x1c0   : > { %v1034_v33 = vpop.permute.xlu1 %1033 }
 0x1c2   : > { %v1036_v35 = vpop.permute.xlu0 %1035 }
 0x1c4   : > { %v922_v36 = vpop.permute.xlu1 %921 }
 0x1c5   : > { %931 = vst.msk [vmem:[#allocation2 + $0xc] sm:$0xf] %vm927_vm9, %v922_v36 }
 0x1c6   : > { %v1032_v34 = vpop.permute.xlu0 %1031 }
 0x1c8   : > { %v1093_v37 = vpop.permute.xlu1 %1092 }
 0x1ca   : > { %v1091_v38 = vpop.permute.xlu0 %1090 }
 0x1cc   : > { %v920_v39 = vpop.permute.xlu1 %919 }
 0x1cd   : > { %930 = vst.msk [vmem:[#allocation2 + $0x8] sm:$0xf] %vm927_vm9, %v920_v39 }
 0x1ce   : > { %v918_v40 = vpop.permute.xlu0 %917 }
 0x1cf   : > { %929 = vst.msk [vmem:[#allocation2 + $0x4] sm:$0xf] %vm927_vm9, %v918_v40 }
 0x1d0   : > { %v1004_v41 = vpop.permute.xlu1 %1003 }
 0x1d2   : > { %v1002_v42 = vpop.permute.xlu0 %1001 }
 0x1d4   : > { %v1089_v43 = vpop.permute.xlu1 %1088 }
 0x1d6   : > { %v1087_v44 = vpop.permute.xlu0 %1086 }
 0x1d8   : > { %v1000_v45 = vpop.permute.xlu1 %999 }
 0x1da   : > { %v998_v46 = vpop.permute.xlu0 %997 }
 0x1db   : > { %1010 = vst.msk [vmem:[#allocation2] sm:$0xf] %vm1009_vm11, %v998_v46 }
 0x1dc   : > { %1027 = vst.msk [vmem:[#allocation2] sm:$0xf] %vm1026_vm12, %v1015_v30  ;;  %v939_v47 = vpop.permute.xlu1 %938 }
 0x1dd   : > { %948 = vst.msk [vmem:[#allocation2 + $0xc] sm:$0xf] %vm944_vm10, %v939_v47 }
 0x1de   : > { %1044 = vst.msk [vmem:[#allocation2] sm:$0xf] %vm1043_vm13, %v1032_v34  ;;  %v1104_v48 = vpop.permute.xlu0 %1103 }
 0x1df   : > { %1013 = vst.msk [vmem:[#allocation2 + $0xc] sm:$0xf] %vm1009_vm11, %v1004_v41 }
 0x1e0   : > { %1030 = vst.msk [vmem:[#allocation2 + $0xc] sm:$0xf] %vm1026_vm12, %v1021_v27  ;;  %v935_v49 = vpop.permute.xlu1 %934 }
 0x1e1   : > { %1047 = vst.msk [vmem:[#allocation2 + $0xc] sm:$0xf] %vm1043_vm13, %v1038_v31 }
 0x1e2   : > { %946 = vst.msk [vmem:[#allocation2 + $0x4] sm:$0xf] %vm944_vm10, %v935_v49  ;;  %v937_v50 = vpop.permute.xlu0 %936 }
 0x1e3   : > { %1011 = vst.msk [vmem:[#allocation2 + $0x4] sm:$0xf] %vm1009_vm11, %v1000_v45 }
 0x1e4   : > { %1028 = vst.msk [vmem:[#allocation2 + $0x4] sm:$0xf] %vm1026_vm12, %v1017_v29  ;;  %v1106_v51 = vpop.permute.xlu1 %1105 }
 0x1e5   : > { %947 = vst.msk [vmem:[#allocation2 + $0x8] sm:$0xf] %vm944_vm10, %v937_v50 }
 0x1e6   : > { %1012 = vst.msk [vmem:[#allocation2 + $0x8] sm:$0xf] %vm1009_vm11, %v1002_v42  ;;  %v1074_v52 = vpop.permute.xlu0 %1073 }
 0x1e7   : > { %1045 = vst.msk [vmem:[#allocation2 + $0x4] sm:$0xf] %vm1043_vm13, %v1034_v33 }
 0x1e8   : > { %1029 = vst.msk [vmem:[#allocation2 + $0x8] sm:$0xf] %vm1026_vm12, %v1019_v26  ;;  %v1076_v53 = vpop.permute.xlu1 %1075 }
 0x1e9   : > { %1046 = vst.msk [vmem:[#allocation2 + $0x8] sm:$0xf] %vm1043_vm13, %v1036_v35 }
 0x1ea   : > { %1084 = vst.msk [vmem:[#allocation2 + $0x8] sm:$0xf] %vm1081_vm14, %v1074_v52  ;;  %1085 = vst.msk [vmem:[#allocation2 + $0xc] sm:$0xf] %vm1081_vm14, %v1076_v53  ;;  %v1070_v12 = vpop.permute.xlu0 %1069 }
 0x1eb   : > { %1101 = vst.msk [vmem:[#allocation2 + $0x8] sm:$0xf] %vm1098_vm15, %v1091_v38  ;;  %1102 = vst.msk [vmem:[#allocation2 + $0xc] sm:$0xf] %vm1098_vm15, %v1093_v37 }
 0x1ec   : > { %1082 = vst.msk [vmem:[#allocation2] sm:$0xf] %vm1081_vm14, %v1070_v12  ;;  %v1072_v55 = vpop.permute.xlu1 %1071 }
 0x1ed   : > { %1099 = vst.msk [vmem:[#allocation2] sm:$0xf] %vm1098_vm15, %v1087_v44 }
 0x1ee   : > { %1083 = vst.msk [vmem:[#allocation2 + $0x4] sm:$0xf] %vm1081_vm14, %v1072_v55  ;;  %v1108_v56 = vpop.permute.xlu0 %1107 }
 0x1ef   : > { %1116 = vst.msk [vmem:[#allocation2] sm:$0xf] %vm1115_vm0, %v1104_v48  ;;  %1118 = vst.msk [vmem:[#allocation2 + $0x8] sm:$0xf] %vm1115_vm0, %v1108_v56 }
 0x1f0   : > { %1100 = vst.msk [vmem:[#allocation2 + $0x4] sm:$0xf] %vm1098_vm15, %v1089_v43  ;;  %v1110_v57 = vpop.permute.xlu1 %1109 }
 0x1f1   : > { %1117 = vst.msk [vmem:[#allocation2 + $0x4] sm:$0xf] %vm1115_vm0, %v1106_v51  ;;  %1119 = vst.msk [vmem:[#allocation2 + $0xc] sm:$0xf] %vm1115_vm0, %v1110_v57 }
 0x1f8   : > { %v1728_v58 = vld [vmem:[#allocation2] sm:$0xff]   ;;  %v1729_v59 = vld [vmem:[#allocation2 + $0x8] sm:$0xff]  }
 0x1f9   : > { %1600 = vmatprep.mubr.msk.bf16.mxu1 %vm1161_vm1, %v1728_v58 }
 0x1fa   : > { %1601 = vmatmul.mubr.msk.bf16.vlgmr.msra.gmra.mrb[8].mxu1 %vm1161_vm1, %v1729_v59 }
 0x1fb   : > { %1605 = vmatpush3.bf16.msra.mxu1 %v1243_v1 }
 0x229   : > { %v1592_v60 = vpop.f32.mrb[4].mxu1 }
 0x22a   : > { %v852_v61 = vpop.f32.mrb[5].mxu1  ;;  %v861_v19 = vadd.f32 %v1592_v60, %v1494_v18 }
 0x22b   : > { %v1593_v62 = vpop.f32.mrb[6].mxu1  ;;  %v853_v20 = vadd.f32 %v1494_v18, %v852_v61 }
 0x22c   : > { %v855_v63 = vpop.f32.mrb[7].mxu1  ;;  %v864_v22 = vadd.f32 %v1593_v62, %v1494_v18  ;;  %v869_v24 = vmax.f32 %v861_v19, 0.0 }
 0x22d   : > { %v856_v23 = vadd.f32 %v1494_v18, %v855_v63  ;;  %v867_v27 = vmax.f32 %v853_v20, 0.0 }
 0x22e   : > { %v870_v30 = vmax.f32 %v864_v22, 0.0 }
 0x22f   : > { %v868_v35 = vmax.f32 %v856_v23, 0.0 }
 0x2cd   : > { %v1602_v3 = vpop.f32.mrb[8].mxu1 }
 0x2ce   : > { %v1215_v4 = vadd.f32 %v1602_v3, %v1507_v2  ;;  %v1206_v5 = vpop.f32.mrb[9].mxu1 }
 0x2cf   : > { %v1207_v6 = vadd.f32 %v1507_v2, %v1206_v5  ;;  %v1603_v7 = vpop.f32.mrb[10].mxu1 }
 0x2d0   : > { %v1218_v8 = vadd.f32 %v1603_v7, %v1507_v2  ;;  %v1209_v9 = vpop.f32.mrb[11].mxu1  ;;  %v1223_v11 = vmax.f32 %v1215_v4, 0.0 }
 0x2d1   : > { %v1210_v10 = vadd.f32 %v1507_v2, %v1209_v9  ;;  %v1221_v14 = vmax.f32 %v1207_v6, 0.0 }
 0x2d2   : > { %v1224_v13 = vmax.f32 %v1218_v8, 0.0 }
 0x2d3   : > { %v1222_v15 = vmax.f32 %v1210_v10, 0.0 }
 0x2d4   : > { %v1226_v16 = vpack.c.bf16 %v1224_v13, %v1223_v11 }
 0x2d5   : > { %v1225_v17 = vpack.c.bf16 %v1222_v15, %v1221_v14 }
 0x2d7   : > { %1606 = vmatprep.mubr.msk.bf16.mxu1 %vm1235_vm2, %v1225_v17 }
 0x2d8   : > { %1607 = vmatmul.mubr.msk.bf16.vlgmr.msra.gmra.mrb[12].mxu1 %vm1235_vm2, %v1226_v16 }
 0x3ab   : > { %v1608_v54 = vpop.f32.mrb[12].mxu1 }
 0x3ac   : > { %v1288_v25 = vadd.f32 %v1608_v54, %v1515_v21  ;;  %v1279_v26 = vpop.f32.mrb[13].mxu1 }
 0x3ad   : > { %v1280_v28 = vadd.f32 %v1515_v21, %v1279_v26  ;;  %v1609_v29 = vpop.f32.mrb[14].mxu1 }
 0x3ae   : > { %v1296_v31 = vadd.f32 %v1288_v25, %v869_v24  ;;  %v1291_v32 = vadd.f32 %v1609_v29, %v1515_v21  ;;  %v1282_v33 = vpop.f32.mrb[15].mxu1 }
 0x3af   : > { %v1294_v36 = vadd.f32 %v1280_v28, %v867_v27  ;;  %v1283_v34 = vadd.f32 %v1515_v21, %v1282_v33 }
 0x3b0   : > { %v1300_v37 = vmax.f32 %v1296_v31, 0.0  ;;  %v1297_v38 = vadd.f32 %v1291_v32, %v870_v30 }
 0x3b1   : > { %v1298_v39 = vmax.f32 %v1294_v36, 0.0  ;;  %v1295_v40 = vadd.f32 %v1283_v34, %v868_v35 }
 0x3b2   : > { %1305 = vst.msk [vmem:[%s464_s12 + $0x10] sm:$0xff] %vm1302_vm3, %v1300_v37  ;;  %v1301_v41 = vmax.f32 %v1297_v38, 0.0 }
 0x3b3   : > { %1303 = vst.msk [vmem:[%s464_s12] sm:$0xff] %vm1302_vm3, %v1298_v39  ;;  %v1299_v42 = vmax.f32 %v1295_v40, 0.0 }
 0x3b4   : > { %1306 = vst.msk [vmem:[%s464_s12 + $0x18] sm:$0xff] %vm1302_vm3, %v1301_v41 }
 0x3b5   : > { %1304 = vst.msk [vmem:[%s464_s12 + $0x8] sm:$0xff] %vm1302_vm3, %v1299_v42 }
 0x3b6   : > { %1771 = shalt.err (!%p1768_p1)
}
 0x3b7   : > { %s1772_s13 = scalar_lea.hbm %s2283_s30, 512  ;;  %s1776_s12 = scalar_lea.hbm %s2384_s25, 2048 }
 0x3b8   : > { %p1773_p4 = scmp.ne.s32.totalorder %s2283_s30, %s1772_s13  ;;  %p1777_p6 = scmp.lt.u32.totalorder %s2283_s30, %s2384_s25 }
 0x3b9   : > { %p1778_p7 = scmp.lt.u32.totalorder %s1776_s12, %s1772_s13  ;;  %p1780_p8 = scmp.lt.u32.totalorder %s1772_s13, %s2283_s30 }
 0x3ba   : > { %p1774_p5 = pnand %p1773_p4, %p2385_p9 }
 0x3bb   : > { %p1779_p3 = por %p1778_p7, %p1777_p6 }
 0x3bc   : > { %p1775_p2 = pneg %p1774_p5 }
 0x3bd   : > { %p1781_p12 = por %p1780_p8, %p1779_p3 }
 0x3bf   : > { %p1782_p10 = pnand %p1781_p12, %p1775_p2 }
 0x3c1   : > { %1785 = shalt.err (!%p1782_p10)
}
 0x3c2   : > { %s1881_s24 = smov 128  }
 0x3c3   : > { %1625 = dma.vmem_to_hbm [thread:$0]  (%p2385_p9), %s2277_s11, 512, %s2283_s30, %s1308_s5, %s1881_s24, %s1881_s24, %s1875_s28  }
 0x3c4 PF: > { %s2386_s15 = sld [smem:[#allocation15_spill]]  ;;  %s2387_s26 = sld [smem:[#allocation21_spill]] }
 0x3c5   : > { %p1631_p11 = scmp.ge.s32.totalorder %s1860_s20, 2 }
 0x3ca   : > { %s1338_s22 = sand.u32 1, %s2386_s15   ;;  %p2388_p13 = scmp.ne.s32.totalorder %s2387_s26, 0 }
 0x3cb   : > { %s1339_s21 = scalar_lea.sflag [#allocation5], %s1338_s22 }
 0x3cc   : > { %p1628_p0 = pnand %p1631_p11, %p2388_p13 }
 0x3ce   : > { %1827 = dma.done.wait (!%p1628_p0), %s1339_s21, 512  }
 0x3cf   : > { %1829 = vsyncadd (!%p1628_p0), %s1339_s21, 4294966784  ;;  %s29_s20 = sadd.s32 1, %s1860_s20   ;;  %s2389_s16 = sld [smem:[#allocation16_spill]] }
 0x3d0   : > { %p26_p1 = scmp.ge.s32.totalorder %s29_s20, 6   ;;  %s2390_s15 = sld [smem:[#allocation22_spill]] }
 0x3d1   : > { %s2391_s23 = sld [smem:[#allocation18_spill]]  ;;  %s2392_s28 = sld [smem:[#allocation19_spill]] }
 0x3d2   : > { %s2393_s13 = smov %s1836_s14  ;;  %s2396_s17 = smov %s1856_s19 }
 0x3d3   :  { %28 = sbr.rel (!%p26_p1) target bundleno = 13 (0xd), region = 123 }
 0x3d5   : > { %s2394_s14 = smov %s2389_s16  ;;  %s2395_s16 = smov %s1852_s18 }
 0x3d7   : > { %s2397_s18 = smov %s2391_s23  ;;  %s2398_s19 = smov %s2392_s28 }
 0x3da   :  { %1344 = vsyncpa [#allocation4], 1 }
 0x3db   :  { %1346 = vsyncpa [#allocation4 + $0x1], 1 }
 0x3dc   :  { %1347 = vsyncpa [#allocation7], 1 }
 0x3dd   :  { %1349 = vsyncpa [#allocation7 + $0x1], 1 }
 0x3de   :  { %1350 = vsyncpa [#allocation5], 1 }
 0x3df   :  { %1352 = vsyncpa [#allocation5 + $0x1], 1 }

</bundles_post_ra>
